<compile_context>
chip_gen: v7x
topology: tpu7x:2x2x1
jax: 0.10.0
libtpu: 0.0.40
codegen_flags: <defaults>
</compile_context>

<pallas_src>
import jax
import jax.numpy as jnp
from jax.experimental import pallas as pl
from jax.experimental.pallas import tpu as pltpu

EPS = 1e-5
_VMEM_LIMIT = 48 * 1024 * 1024   # leaves headroom even on v7x (64 MiB physical)


# ------------------------------ helpers ------------------------------------ #

def _round_up(x, m):
    return ((x + m - 1) // m) * m


def _pick_tile(dim, candidates):
    for t in candidates:
        if dim % t == 0:
            return t
    return dim


def _pad2d(a, rows, cols):
    r, c = a.shape
    return jnp.pad(a, ((0, rows - r), (0, cols - c)))


# ----------------------------- Pallas kernels ------------------------------ #

def _matmul_kernel(a_ref, b_ref, o_ref, acc_ref):
    """K-tiled bf16 matmul with fp32 accumulator scratch."""
    @pl.when(pl.program_id(2) == 0)
    def _():
        acc_ref[...] = jnp.zeros_like(acc_ref)

    acc_ref[...] += jnp.dot(a_ref[...], b_ref[...],
                            preferred_element_type=jnp.float32)

    @pl.when(pl.program_id(2) == pl.num_programs(2) - 1)
    def _():
        o_ref[...] = acc_ref[...]


def _residual_proj_kernel(y_ref, s_ref, b_ref, sc_ref, scw_ref, o_ref):
    """out = (y * scale3 + bias3) + shortcut_in @ shortcut_W  (bf16 matmul)."""
    y = y_ref[...] * s_ref[...] + b_ref[...]
    o_ref[...] = y + jnp.dot(sc_ref[...], scw_ref[...],
                             preferred_element_type=jnp.float32)


def _residual_id_kernel(y_ref, s_ref, b_ref, sc_ref, o_ref):
    """out = (y * scale3 + bias3) + shortcut_in   (identity shortcut, VPU add)."""
    o_ref[...] = y_ref[...] * s_ref[...] + b_ref[...] + sc_ref[...]


# ----------------------------- Pallas wrappers ------------------------------ #

def _pallas_matmul(a, b):
    """(M,K) @ (K,N) -> (M,N) fp32; operands cast to bf16, dims padded."""
    m, k = a.shape
    _, n = b.shape
    mp = _round_up(m, 256)
    kp = _round_up(k, 128)
    np_ = _round_up(n, 128)
    a = _pad2d(a.astype(jnp.bfloat16), mp, kp)
    b = _pad2d(b.astype(jnp.bfloat16), kp, np_)
    tm = _pick_tile(mp, (512, 256))
    tn = _pick_tile(np_, (256, 128))
    tk = _pick_tile(kp, (512, 256, 128))
    out = pl.pallas_call(
        _matmul_kernel,
        out_shape=jax.ShapeDtypeStruct((mp, np_), jnp.float32),
        grid_spec=pltpu.PrefetchScalarGridSpec(
            num_scalar_prefetch=0,
            grid=(mp // tm, np_ // tn, kp // tk),
            in_specs=[pl.BlockSpec((tm, tk), lambda i, j, kk: (i, kk)),
                      pl.BlockSpec((tk, tn), lambda i, j, kk: (kk, j))],
            out_specs=pl.BlockSpec((tm, tn), lambda i, j, kk: (i, j)),
            scratch_shapes=[pltpu.VMEM((tm, tn), jnp.float32)]),
        compiler_params=pltpu.CompilerParams(
            dimension_semantics=("parallel", "parallel", "arbitrary"),
            vmem_limit_bytes=_VMEM_LIMIT),
    )(a, b)
    return out[:m, :n]


def _residual_proj(y2, scale3, bias3, sc_in, sc_w):
    m, n = y2.shape
    k = sc_in.shape[1]
    mp = _round_up(m, 256)
    np_ = _round_up(n, 128)
    kp = _round_up(k, 128)
    y2p = _pad2d(y2, mp, np_)
    s3 = _pad2d(scale3[None, :], 1, np_)
    b3 = _pad2d(bias3[None, :], 1, np_)
    scp = _pad2d(sc_in.astype(jnp.bfloat16), mp, kp)
    scw = _pad2d(sc_w.astype(jnp.bfloat16), kp, np_)
    tm = _pick_tile(mp, (512, 256))
    tn = _pick_tile(np_, (256, 128))
    out = pl.pallas_call(
        _residual_proj_kernel,
        out_shape=jax.ShapeDtypeStruct((mp, np_), jnp.float32),
        grid_spec=pltpu.PrefetchScalarGridSpec(
            num_scalar_prefetch=0,
            grid=(mp // tm, np_ // tn),
            in_specs=[pl.BlockSpec((tm, tn), lambda i, j: (i, j)),
                      pl.BlockSpec((1, tn), lambda i, j: (0, j)),
                      pl.BlockSpec((1, tn), lambda i, j: (0, j)),
                      pl.BlockSpec((tm, kp), lambda i, j: (i, 0)),
                      pl.BlockSpec((kp, tn), lambda i, j: (0, j))],
            out_specs=pl.BlockSpec((tm, tn), lambda i, j: (i, j))),
        compiler_params=pltpu.CompilerParams(
            dimension_semantics=("parallel", "parallel"),
            vmem_limit_bytes=_VMEM_LIMIT),
    )(y2p, s3, b3, scp, scw)
    return out[:m, :n]


def _residual_identity(y2, scale3, bias3, sc_in):
    m, n = y2.shape
    mp = _round_up(m, 256)
    np_ = _round_up(n, 128)
    y2p = _pad2d(y2, mp, np_)
    s3 = _pad2d(scale3[None, :], 1, np_)
    b3 = _pad2d(bias3[None, :], 1, np_)
    scp = _pad2d(sc_in.astype(jnp.float32), mp, np_)
    tm = _pick_tile(mp, (512, 256))
    tn = _pick_tile(np_, (256, 128))
    out = pl.pallas_call(
        _residual_id_kernel,
        out_shape=jax.ShapeDtypeStruct((mp, np_), jnp.float32),
        grid_spec=pltpu.PrefetchScalarGridSpec(
            num_scalar_prefetch=0,
            grid=(mp // tm, np_ // tn),
            in_specs=[pl.BlockSpec((tm, tn), lambda i, j: (i, j)),
                      pl.BlockSpec((1, tn), lambda i, j: (0, j)),
                      pl.BlockSpec((1, tn), lambda i, j: (0, j)),
                      pl.BlockSpec((tm, tn), lambda i, j: (i, j))],
            out_specs=pl.BlockSpec((tm, tn), lambda i, j: (i, j))),
        compiler_params=pltpu.CompilerParams(
            dimension_semantics=("parallel", "parallel"),
            vmem_limit_bytes=_VMEM_LIMIT),
    )(y2p, s3, b3, scp)
    return out[:m, :n]


# ------------------------------- JAX glue ---------------------------------- #

def _im2col(x, ksize, stride, pad):
    """x: (N,H,W,C) -> (N*Ho*Wo, ksize*ksize*C), zero padding, NHWC."""
    n, h, w, c = x.shape
    xp = jnp.pad(x, ((0, 0), (pad, pad), (pad, pad), (0, 0)))
    ho = (h + 2 * pad - ksize) // stride + 1
    wo = (w + 2 * pad - ksize) // stride + 1
    cols = []
    for kh in range(ksize):
        for kw in range(ksize):
            patch = xp[:, kh:kh + (ho - 1) * stride + 1:stride,
                          kw:kw + (wo - 1) * stride + 1:stride, :]
            cols.append(patch)
    return jnp.concatenate(cols, axis=-1).reshape(n * ho * wo, ksize * ksize * c)


def _bn_affine(mean, var, gamma, beta):
    scale = gamma / jnp.sqrt(var + EPS)
    bias = beta - mean * scale
    return scale, bias


def basic_block_forward(x_nchw, params, *, stride, remove_first_relu,
                        add_last_bn, preact):
    x = jnp.transpose(x_nchw, (0, 2, 3, 1)).astype(jnp.float32)  # NHWC
    n, h, w, cin = x.shape
    w1 = params["conv1_w"]            # (Cout, Cin, 3, 3)
    w2 = params["conv2_w"]            # (Cout, Cout, 3, 3)
    cout = w1.shape[0]

    # --- BN1 (training-mode batch stats) applied BEFORE im2col (no mask) ---
    scale1, bias1 = _bn_affine(jnp.mean(x, axis=(0, 1, 2)),
                               jnp.var(x, axis=(0, 1, 2)),
                               params["bn1_gamma"], params["bn1_beta"])
    x_bn1 = x * scale1 + bias1
    x_bn1_relu = jnp.maximum(x_bn1, 0.0)

    if preact:
        conv1_in = x_bn1_relu
        x_sc = x_bn1_relu                       # torch rebinds x = relu(bn1(x))
    else:
        conv1_in = x_bn1 if remove_first_relu else x_bn1_relu
        x_sc = x                                # shortcut sees the raw input

    # --- conv1 as bf16 im2col matmul ---
    ho = (h - 1) // stride + 1
    wo = (w - 1) // stride + 1
    m = n * ho * wo
    p1 = _im2col(conv1_in.astype(jnp.bfloat16), 3, stride, 1)
    w1m = jnp.transpose(w1, (2, 3, 1, 0)).reshape(9 * cin, cout)
    y1 = _pallas_matmul(p1, w1m)                                   # (M, Cout) f32

    # --- BN2 (batch stats) + ReLU applied pre-im2col ---
    scale2, bias2 = _bn_affine(jnp.mean(y1, axis=0), jnp.var(y1, axis=0),
                               params["bn2_gamma"], params["bn2_beta"])
    y1_act = jnp.maximum(y1 * scale2 + bias2, 0.0)
    p2 = _im2col(y1_act.reshape(n, ho, wo, cout).astype(jnp.bfloat16), 3, 1, 1)
    w2m = jnp.transpose(w2, (2, 3, 1, 0)).reshape(9 * cout, cout)
    y2 = _pallas_matmul(p2, w2m)                                   # (M, Cout) f32

    # --- optional BN3 (batch stats of conv2 output) ---
    if add_last_bn:
        scale3, bias3 = _bn_affine(jnp.mean(y2, axis=0), jnp.var(y2, axis=0),
                                   params["bn3_gamma"], params["bn3_beta"])
    else:
        scale3 = jnp.ones((cout,), jnp.float32)
        bias3 = jnp.zeros((cout,), jnp.float32)

    # --- fused BN3 + shortcut + residual add ---
    if cin != cout:
        sc_in = x_sc[:, ::stride, ::stride, :].reshape(m, cin)     # 1x1 stride conv
        sc_w = jnp.transpose(params["shortcut_w"].reshape(cout, cin), (1, 0))
        out = _residual_proj(y2, scale3, bias3, sc_in, sc_w)
    else:
        if stride != 1:
            raise ValueError("identity shortcut requires stride == 1 "
                             "(same restriction as the PyTorch module)")
        out = _residual_identity(y2, scale3, bias3, x_sc.reshape(m, cin))

    return jnp.transpose(out.reshape(n, ho, wo, cout), (0, 3, 1, 2))  # NCHW


# --------------------------------- main ------------------------------------ #

def _init_params(key, cin, cout, add_last_bn, has_shortcut):
    ks = jax.random.split(key, 9)
    p = {
        "conv1_w": 0.1 * jax.random.normal(ks[0], (cout, cin, 3, 3), jnp.float32),
        "conv2_w": 0.1 * jax.random.normal(ks[1], (cout, cout, 3, 3), jnp.float32),
        "bn1_gamma": 1.0 + 0.1 * jax.random.normal(ks[2], (cin,), jnp.float32),
        "bn1_beta": 0.1 * jax.random.normal(ks[3], (cin,), jnp.float32),
        "bn2_gamma": 1.0 + 0.1 * jax.random.normal(ks[4], (cout,), jnp.float32),
        "bn2_beta": 0.1 * jax.random.normal(ks[5], (cout,), jnp.float32),
    }
    if add_last_bn:
        p["bn3_gamma"] = 1.0 + 0.1 * jax.random.normal(ks[6], (cout,), jnp.float32)
        p["bn3_beta"] = 0.1 * jax.random.normal(ks[7], (cout,), jnp.float32)
    if has_shortcut:
        p["shortcut_w"] = 0.1 * jax.random.normal(ks[8], (cout, cin, 1, 1), jnp.float32)
    return p


if __name__ == "__main__":
    key = jax.random.PRNGKey(0)
    k_x, k_p = jax.random.split(key)

    batch, in_channels, out_channels, spatial, stride = 2, 4, 8, 16, 2
    remove_first_relu, add_last_bn, preact = False, True, False

    x = jax.random.normal(k_x, (batch, in_channels, spatial, spatial), jnp.float32)
    params = _init_params(k_p, in_channels, out_channels, add_last_bn,
                          has_shortcut=(in_channels != out_channels))

    y = basic_block_forward(x, params, stride=stride,
                            remove_first_relu=remove_first_relu,
                            add_last_bn=add_last_bn, preact=preact)
    y = jax.block_until_ready(y)

    expected = (batch, out_channels, spatial // stride, spatial // stride)
    assert y.shape == expected, (y.shape, expected)
    assert jnp.all(jnp.isfinite(y))
    print("KERNEL_OK")
</pallas_src>

<mosaic_0001>
module attributes {stable_mosaic.version = 11 : i64} {
  func.func @_matmul_kernel(%arg0: i32, %arg1: i32, %arg2: i32, %arg3: memref<256x128xbf16, #tpu.memory_space<vmem>>, %arg4: memref<128x128xbf16, #tpu.memory_space<vmem>>, %arg5: memref<256x128xf32, #tpu.memory_space<vmem>>, %arg6: memref<256x128xf32, #tpu.memory_space<vmem>>) attributes {dimension_semantics = [#tpu.dimension_semantics<parallel>, #tpu.dimension_semantics<parallel>, #tpu.dimension_semantics<arbitrary>], iteration_bounds = array<i64: 1, 1, 1>, scalar_prefetch = 0 : i64, scratch_operands = 1 : i64, tpu.core_type = #tpu.core_type<tc>, window_params = [{transform_indices = @transform_0, window_bounds = array<i64: 256, 128>}, {transform_indices = @transform_1, window_bounds = array<i64: 128, 128>}, {transform_indices = @transform_2, window_bounds = array<i64: 256, 128>}]} {
    %c0_i32 = arith.constant 0 : i32
    %0 = arith.cmpi eq, %arg2, %c0_i32 : i32
    %1 = arith.extui %0 : i1 to i32
    %c0_i32_0 = arith.constant 0 : i32
    %2 = arith.cmpi ne, %1, %c0_i32_0 : i32
    scf.if %2 {
      %cst_10 = arith.constant 0.000000e+00 : f32
      %12 = vector.broadcast %cst_10 : f32 to vector<256x128xf32>
      %c0_11 = arith.constant 0 : index
      %c0_12 = arith.constant 0 : index
      %13 = vector.load %arg6[%c0_11, %c0_12] : memref<256x128xf32, #tpu.memory_space<vmem>>, vector<256x128xf32>
      tpu.vector_store %arg6[%c0_11, %c0_12], %12 {strides = array<i32>} : memref<256x128xf32, #tpu.memory_space<vmem>>, vector<256x128xf32>,
    } else {
    }
    %c0 = arith.constant 0 : index
    %c0_1 = arith.constant 0 : index
    %3 = vector.load %arg6[%c0, %c0_1] : memref<256x128xf32, #tpu.memory_space<vmem>>, vector<256x128xf32>
    %c0_2 = arith.constant 0 : index
    %c0_3 = arith.constant 0 : index
    %4 = vector.load %arg3[%c0_2, %c0_3] : memref<256x128xbf16, #tpu.memory_space<vmem>>, vector<256x128xbf16>
    %c0_4 = arith.constant 0 : index
    %c0_5 = arith.constant 0 : index
    %5 = vector.load %arg4[%c0_4, %c0_5] : memref<128x128xbf16, #tpu.memory_space<vmem>>, vector<128x128xbf16>
    %cst = arith.constant dense<0.000000e+00> : vector<256x128xf32>
    %6 = tpu.matmul %4, %5, %cst {dimension_numbers = #tpu.dot_dimension_numbers<[1], [0], [0], [1], [0, 0, 1, 1], [], []>} : vector<256x128xbf16>, vector<128x128xbf16>, vector<256x128xf32> -> vector<256x128xf32>
    %7 = arith.addf %3, %6 : vector<256x128xf32>
    %c0_6 = arith.constant 0 : index
    %c0_7 = arith.constant 0 : index
    %8 = vector.load %arg6[%c0_6, %c0_7] : memref<256x128xf32, #tpu.memory_space<vmem>>, vector<256x128xf32>
    tpu.vector_store %arg6[%c0_6, %c0_7], %7 {strides = array<i32>} : memref<256x128xf32, #tpu.memory_space<vmem>>, vector<256x128xf32>,
    %c0_i32_8 = arith.constant 0 : i32
    %9 = arith.cmpi eq, %arg2, %c0_i32_8 : i32
    %10 = arith.extui %9 : i1 to i32
    %c0_i32_9 = arith.constant 0 : i32
    %11 = arith.cmpi ne, %10, %c0_i32_9 : i32
    scf.if %11 {
      %c0_10 = arith.constant 0 : index
      %c0_11 = arith.constant 0 : index
      %12 = vector.load %arg6[%c0_10, %c0_11] : memref<256x128xf32, #tpu.memory_space<vmem>>, vector<256x128xf32>
      %c0_12 = arith.constant 0 : index
      %c0_13 = arith.constant 0 : index
      %13 = vector.load %arg5[%c0_12, %c0_13] : memref<256x128xf32, #tpu.memory_space<vmem>>, vector<256x128xf32>
      tpu.vector_store %arg5[%c0_12, %c0_13], %12 {strides = array<i32>} : memref<256x128xf32, #tpu.memory_space<vmem>>, vector<256x128xf32>,
    } else {
    }
    return
  }
  func.func @transform_0(%arg0: i32, %arg1: i32, %arg2: i32) -> (i32, i32) {
    %c0_i32 = arith.constant 0 : i32
    return %arg0, %arg2 : i32, i32
  }
  func.func @transform_1(%arg0: i32, %arg1: i32, %arg2: i32) -> (i32, i32) {
    %c0_i32 = arith.constant 0 : i32
    return %arg2, %arg1 : i32, i32
  }
  func.func @transform_2(%arg0: i32, %arg1: i32, %arg2: i32) -> (i32, i32) {
    %c0_i32 = arith.constant 0 : i32
    return %arg0, %arg1 : i32, i32
  }
}

</mosaic_0001>

<bundles_post_ra>
// kernel: tpu_custom_call.1
= control target key start
LH: loop header
LB: loop body
LE: loop exit
PB: predicated region body
PF: predicated region fallthrough
CT: control target
= control target key end

     0   :  { %7 = vsyncpa [#allocation4], 0  ;;  %s884_s0 = inlined_call_operand.hbm [shape: bf16[256,128], index: 0, kind: input, shape index: {}]   ;;  %s885_s1 = inlined_call_operand.hbm [shape: bf16[128,128], index: 1, kind: input, shape index: {}]   ;;  %s886_s2 = inlined_call_operand.hbm [shape: f32[256,128], index: 2, kind: output, shape index: {}]  }
   0x1   :  { %8 = vsyncpa [#allocation7], 0 }
   0x2   :  { %9 = vsyncpa [#allocation5], 0  ;;  %s826_s9 = smov [#allocation3]   ;;  %s754_s13 = scalar_lea.hbm %s884_s0, 2048 }
   0x3   :  { %s15_s10 = sshll.u32 %s826_s9, 4  ;;  %p755_p0 = scmp.ne.s32.totalorder %s884_s0, %s754_s13  ;;  %s16_s10 = int_to_ptr.vmem [resolvable:$true] %s15_s10 }
   0x4   :  { %p758_p1 = scmp.lt.u32.totalorder %s754_s13, %s884_s0 }
   0x6   :  { %p760_p2 = pnand %p758_p1, %p755_p0 }
   0x8   :  { %763 = shalt.err (!%p760_p2)
}
   0x9   :  { %s764_s18 = scalar_lea.vmem %s16_s10, 2048  ;;  %p769_p4 = scmp.lt.s32.totalorder %s16_s10, %s16_s10 }
   0xa   :  { %p765_p3 = scmp.ne.s32.totalorder %s16_s10, %s764_s18  ;;  %p770_p5 = scmp.lt.s32.totalorder %s764_s18, %s764_s18 }
   0xc   :  { %p771_p6 = por %p770_p5, %p769_p4 }
   0xe   :  { %p772_p7 = pnand %p771_p6, %p765_p3 }
  0x10   :  { %775 = shalt.err (!%p772_p7)
}
  0x11   :  { %s827_s19 = smov 64   ;;  %s828_s20 = smov 4  }
  0x12   :  { %21 = dma.hbm_to_vmem [thread:$0]  %s884_s0, 2048, %s16_s10, [#allocation4], %s827_s19, %s827_s19, %s828_s20  }
  0x13   :  { %s829_s23 = smov [#allocation6]   ;;  %s776_s27 = scalar_lea.hbm %s885_s1, 1024 }
  0x14   :  { %s27_s24 = sshll.u32 %s829_s23, 4  ;;  %p777_p8 = scmp.ne.s32.totalorder %s885_s1, %s776_s27  ;;  %s28_s24 = int_to_ptr.vmem [resolvable:$true] %s27_s24 }
  0x15   :  { %p780_p9 = scmp.lt.u32.totalorder %s776_s27, %s885_s1 }
  0x17   :  { %p782_p10 = pnand %p780_p9, %p777_p8 }
  0x19   :  { %785 = shalt.err (!%p782_p10)
}
  0x1a   :  { %s786_s4 = scalar_lea.vmem %s28_s24, 1024  ;;  %p791_p12 = scmp.lt.s32.totalorder %s28_s24, %s28_s24 }
  0x1b   :  { %p787_p11 = scmp.ne.s32.totalorder %s28_s24, %s786_s4  ;;  %p792_p13 = scmp.lt.s32.totalorder %s786_s4, %s786_s4 }
  0x1d   :  { %p793_p0 = por %p792_p13, %p791_p12 }
  0x1f   :  { %p794_p1 = pnand %p793_p0, %p787_p11 }
  0x21   :  { %797 = shalt.err (!%p794_p1)
}
  0x22   :  { %33 = dma.hbm_to_vmem [thread:$0]  %s885_s1, 1024, %s28_s24, [#allocation7], %s827_s19, %s827_s19, %s828_s20  }
  0x23   :  { %820 = dma.done.wait [#allocation4], 2048  }
  0x24   :  { %821 = vsyncadd [#allocation4], 4294965248 }
  0x25   :  { %822 = dma.done.wait [#allocation7], 1024  }
  0x26   :  { %823 = vsyncadd [#allocation7], 4294966272  ;;  %v730_v0 = vld [vmem:[#allocation6] sm:$0xff]   ;;  %v731_v1 = vld [vmem:[#allocation6 + $0x8] sm:$0xff]   ;;  %s830_s1 = smov [#allocation8]  }
  0x27   :  { %659 = vmatprep.subr.bf16.mxu0 %v730_v0  ;;  %707 = vmatprep.subr.bf16.mxu1 %v730_v0  ;;  %v732_v2 = vld [vmem:[#allocation6 + $0x10] sm:$0xff]   ;;  %v733_v3 = vld [vmem:[#allocation6 + $0x18] sm:$0xff]   ;;  %v738_v4 = vld [vmem:[#allocation3] sm:$0xff]   ;;  %s598_s6 = sshll.u32 %s830_s1, 4  ;;  %s599_s6 = int_to_ptr.vmem [resolvable:$true] %s598_s6 }
  0x28   :  { %660 = vmatpush3.bf16.msra.mxu0 %v730_v0  ;;  %715 = vmatpush3.bf16.msra.mxu1 %v730_v0  ;;  %v739_v5 = vld [vmem:[#allocation3 + $0x40] sm:$0xff]   ;;  %v735_v7 = vld [vmem:[#allocation6 + $0x28] sm:$0xff]   ;;  %v736_v8 = vld [vmem:[#allocation6 + $0x30] sm:$0xff]   ;;  %s798_s7 = scalar_lea.vmem %s599_s6, 4096  ;;  %p803_p3 = scmp.lt.s32.totalorder %s599_s6, %s599_s6 }
  0x29   :  { %661 = vmatprep.subr.bf16.mxu0 %v731_v1  ;;  %708 = vmatprep.subr.bf16.mxu1 %v731_v1  ;;  %v734_v6 = vld [vmem:[#allocation6 + $0x20] sm:$0xff]   ;;  %v737_v9 = vld [vmem:[#allocation6 + $0x38] sm:$0xff]   ;;  %v740_v10 = vld [vmem:[#allocation3 + $0x8] sm:$0xff]   ;;  %p799_p2 = scmp.ne.s32.totalorder %s599_s6, %s798_s7  ;;  %p804_p4 = scmp.lt.s32.totalorder %s798_s7, %s798_s7 }
  0x2a   :  { %675 = vmatprep.mubr.bf16.mxu0 %v738_v4  ;;  %691 = vmatprep.mubr.bf16.mxu1 %v739_v5  ;;  %v741_v11 = vld [vmem:[#allocation3 + $0x48] sm:$0xff]   ;;  %v742_v12 = vld [vmem:[#allocation3 + $0x10] sm:$0xff]   ;;  %v744_v14 = vld [vmem:[#allocation3 + $0x18] sm:$0xff]  }
  0x2b   :  { %v743_v13 = vld [vmem:[#allocation3 + $0x50] sm:$0xff]   ;;  %v745_v15 = vld [vmem:[#allocation3 + $0x58] sm:$0xff]   ;;  %v746_v16 = vld [vmem:[#allocation3 + $0x20] sm:$0xff]   ;;  %p805_p5 = por %p804_p4, %p803_p3 }
  0x2c   :  { %662 = vmatpush3.bf16.msra.mxu0 %v731_v1  ;;  %716 = vmatpush3.bf16.msra.mxu1 %v731_v1  ;;  %v747_v17 = vld [vmem:[#allocation3 + $0x60] sm:$0xff]   ;;  %v748_v18 = vld [vmem:[#allocation3 + $0x28] sm:$0xff]   ;;  %v750_v20 = vld [vmem:[#allocation3 + $0x30] sm:$0xff]  }
  0x2d   :  { %663 = vmatprep.subr.bf16.mxu0 %v732_v2  ;;  %709 = vmatprep.subr.bf16.mxu1 %v732_v2  ;;  %v749_v19 = vld [vmem:[#allocation3 + $0x68] sm:$0xff]   ;;  %v751_v21 = vld [vmem:[#allocation3 + $0x70] sm:$0xff]   ;;  %v752_v22 = vld [vmem:[#allocation3 + $0x38] sm:$0xff]   ;;  %p806_p6 = pnand %p805_p5, %p799_p2 }
  0x2e   :  { %v753_v23 = vld [vmem:[#allocation3 + $0x78] sm:$0xff]  }
  0x30   :  { %664 = vmatpush3.bf16.msra.mxu0 %v732_v2  ;;  %717 = vmatpush3.bf16.msra.mxu1 %v732_v2 }
  0x31   :  { %665 = vmatprep.subr.bf16.mxu0 %v733_v3  ;;  %710 = vmatprep.subr.bf16.mxu1 %v733_v3 }
  0x34   :  { %666 = vmatpush3.bf16.msra.mxu0 %v733_v3  ;;  %718 = vmatpush3.bf16.msra.mxu1 %v733_v3 }
  0x35   :  { %667 = vmatprep.subr.bf16.mxu0 %v734_v6  ;;  %711 = vmatprep.subr.bf16.mxu1 %v734_v6 }
  0x38   :  { %668 = vmatpush3.bf16.msra.mxu0 %v734_v6  ;;  %719 = vmatpush3.bf16.msra.mxu1 %v734_v6 }
  0x39   :  { %669 = vmatprep.subr.bf16.mxu0 %v735_v7  ;;  %712 = vmatprep.subr.bf16.mxu1 %v735_v7 }
  0x3c   :  { %670 = vmatpush3.bf16.msra.mxu0 %v735_v7  ;;  %720 = vmatpush3.bf16.msra.mxu1 %v735_v7 }
  0x3d   :  { %671 = vmatprep.subr.bf16.mxu0 %v736_v8  ;;  %713 = vmatprep.subr.bf16.mxu1 %v736_v8 }
  0x40   :  { %672 = vmatpush3.bf16.msra.mxu0 %v736_v8  ;;  %721 = vmatpush3.bf16.msra.mxu1 %v736_v8 }
  0x41   :  { %673 = vmatprep.subr.bf16.mxu0 %v737_v9  ;;  %714 = vmatprep.subr.bf16.mxu1 %v737_v9 }
  0x44   :  { %674 = vmatpush3.bf16.msra.mxu0 %v737_v9  ;;  %722 = vmatpush3.bf16.msra.mxu1 %v737_v9 }
  0x47   :  { %676 = vmatmul.mubr.bf16.vlgmr.msra.gmra.mrb[0].mxu0 %v740_v10  ;;  %692 = vmatmul.mubr.bf16.vlgmr.msra.gmra.mrb[0].mxu1 %v741_v11 }
  0x48   :  { %679 = vmatprep.mubr.bf16.mxu0 %v742_v12  ;;  %695 = vmatprep.mubr.bf16.mxu1 %v743_v13 }
  0x4f   :  { %680 = vmatmul.mubr.bf16.gmra.mrb[4].mxu0 %v744_v14  ;;  %696 = vmatmul.mubr.bf16.gmra.mrb[4].mxu1 %v745_v15 }
  0x50   :  { %683 = vmatprep.mubr.bf16.mxu0 %v746_v16  ;;  %699 = vmatprep.mubr.bf16.mxu1 %v747_v17 }
  0x57   :  { %684 = vmatmul.mubr.bf16.gmra.mrb[8].mxu0 %v748_v18  ;;  %700 = vmatmul.mubr.bf16.gmra.mrb[8].mxu1 %v749_v19 }
  0x58   :  { %687 = vmatprep.mubr.bf16.mxu0 %v750_v20  ;;  %703 = vmatprep.mubr.bf16.mxu1 %v751_v21 }
  0x5f   :  { %688 = vmatmul.mubr.bf16.gmra.mrb[12].mxu0 %v752_v22  ;;  %704 = vmatmul.mubr.bf16.gmra.mrb[12].mxu1 %v753_v23 }
 0x11a   :  { %v677_v24 = vpop.f32.mrb[0].mxu0  ;;  %v693_v25 = vpop.f32.mrb[0].mxu1 }
 0x11b   :  { %563 = vst [vmem:[#allocation8 + $0x10] sm:$0xff] %v677_v24  ;;  %579 = vst [vmem:[#allocation8 + $0x90] sm:$0xff] %v693_v25  ;;  %v335_v26 = vpop.f32.mrb[1].mxu0  ;;  %v399_v27 = vpop.f32.mrb[1].mxu1 }
 0x11c   :  { %561 = vst [vmem:[#allocation8] sm:$0xff] %v335_v26  ;;  %577 = vst [vmem:[#allocation8 + $0x80] sm:$0xff] %v399_v27  ;;  %v678_v28 = vpop.f32.mrb[2].mxu0  ;;  %v694_v29 = vpop.f32.mrb[2].mxu1 }
 0x11d   :  { %564 = vst [vmem:[#allocation8 + $0x18] sm:$0xff] %v678_v28  ;;  %580 = vst [vmem:[#allocation8 + $0x98] sm:$0xff] %v694_v29  ;;  %v338_v30 = vpop.f32.mrb[3].mxu0  ;;  %v402_v31 = vpop.f32.mrb[3].mxu1 }
 0x11e   :  { %562 = vst [vmem:[#allocation8 + $0x8] sm:$0xff] %v338_v30  ;;  %578 = vst [vmem:[#allocation8 + $0x88] sm:$0xff] %v402_v31 }
 0x122   :  { %v681_v32 = vpop.f32.mrb[4].mxu0  ;;  %v697_v33 = vpop.f32.mrb[4].mxu1 }
 0x123   :  { %567 = vst [vmem:[#allocation8 + $0x30] sm:$0xff] %v681_v32  ;;  %583 = vst [vmem:[#allocation8 + $0xb0] sm:$0xff] %v697_v33  ;;  %v351_v34 = vpop.f32.mrb[5].mxu0  ;;  %v415_v35 = vpop.f32.mrb[5].mxu1 }
 0x124   :  { %565 = vst [vmem:[#allocation8 + $0x20] sm:$0xff] %v351_v34  ;;  %581 = vst [vmem:[#allocation8 + $0xa0] sm:$0xff] %v415_v35  ;;  %v682_v36 = vpop.f32.mrb[6].mxu0  ;;  %v698_v37 = vpop.f32.mrb[6].mxu1 }
 0x125   :  { %568 = vst [vmem:[#allocation8 + $0x38] sm:$0xff] %v682_v36  ;;  %584 = vst [vmem:[#allocation8 + $0xb8] sm:$0xff] %v698_v37  ;;  %v354_v38 = vpop.f32.mrb[7].mxu0  ;;  %v418_v39 = vpop.f32.mrb[7].mxu1 }
 0x126   :  { %566 = vst [vmem:[#allocation8 + $0x28] sm:$0xff] %v354_v38  ;;  %582 = vst [vmem:[#allocation8 + $0xa8] sm:$0xff] %v418_v39 }
 0x12a   :  { %v685_v40 = vpop.f32.mrb[8].mxu0  ;;  %v701_v41 = vpop.f32.mrb[8].mxu1 }
 0x12b   :  { %571 = vst [vmem:[#allocation8 + $0x50] sm:$0xff] %v685_v40  ;;  %587 = vst [vmem:[#allocation8 + $0xd0] sm:$0xff] %v701_v41  ;;  %v367_v42 = vpop.f32.mrb[9].mxu0  ;;  %v431_v43 = vpop.f32.mrb[9].mxu1 }
 0x12c   :  { %569 = vst [vmem:[#allocation8 + $0x40] sm:$0xff] %v367_v42  ;;  %585 = vst [vmem:[#allocation8 + $0xc0] sm:$0xff] %v431_v43  ;;  %v686_v44 = vpop.f32.mrb[10].mxu0  ;;  %v702_v45 = vpop.f32.mrb[10].mxu1 }
 0x12d   :  { %572 = vst [vmem:[#allocation8 + $0x58] sm:$0xff] %v686_v44  ;;  %588 = vst [vmem:[#allocation8 + $0xd8] sm:$0xff] %v702_v45  ;;  %v370_v46 = vpop.f32.mrb[11].mxu0  ;;  %v434_v47 = vpop.f32.mrb[11].mxu1 }
 0x12e   :  { %570 = vst [vmem:[#allocation8 + $0x48] sm:$0xff] %v370_v46  ;;  %586 = vst [vmem:[#allocation8 + $0xc8] sm:$0xff] %v434_v47 }
 0x132   :  { %v689_v48 = vpop.f32.mrb[12].mxu0  ;;  %v705_v49 = vpop.f32.mrb[12].mxu1 }
 0x133   :  { %575 = vst [vmem:[#allocation8 + $0x70] sm:$0xff] %v689_v48  ;;  %591 = vst [vmem:[#allocation8 + $0xf0] sm:$0xff] %v705_v49  ;;  %v383_v50 = vpop.f32.mrb[13].mxu0  ;;  %v447_v51 = vpop.f32.mrb[13].mxu1 }
 0x134   :  { %573 = vst [vmem:[#allocation8 + $0x60] sm:$0xff] %v383_v50  ;;  %589 = vst [vmem:[#allocation8 + $0xe0] sm:$0xff] %v447_v51  ;;  %v690_v52 = vpop.f32.mrb[14].mxu0  ;;  %v706_v53 = vpop.f32.mrb[14].mxu1 }
 0x135   :  { %576 = vst [vmem:[#allocation8 + $0x78] sm:$0xff] %v690_v52  ;;  %592 = vst [vmem:[#allocation8 + $0xf8] sm:$0xff] %v706_v53  ;;  %v386_v54 = vpop.f32.mrb[15].mxu0  ;;  %v450_v55 = vpop.f32.mrb[15].mxu1 }
 0x136   :  { %574 = vst [vmem:[#allocation8 + $0x68] sm:$0xff] %v386_v54  ;;  %590 = vst [vmem:[#allocation8 + $0xe8] sm:$0xff] %v450_v55 }
 0x137   :  { %809 = shalt.err (!%p806_p6)
}
 0x138   :  { %s810_s10 = scalar_lea.hbm %s886_s2, 4096 }
 0x139   :  { %p811_p7 = scmp.ne.s32.totalorder %s886_s2, %s810_s10  ;;  %p814_p8 = scmp.lt.u32.totalorder %s810_s10, %s886_s2 }
 0x13b   :  { %p816_p9 = pnand %p814_p8, %p811_p7 }
 0x13d   :  { %819 = shalt.err (!%p816_p9)
}
 0x13e   :  { %s831_s15 = smov 128   ;;  %s832_s16 = smov 8  }
 0x13f   :  { %604 = dma.vmem_to_hbm [thread:$0]  %s599_s6, 4096, %s886_s2, [#allocation5], %s831_s15, %s831_s15, %s832_s16  }
 0x140   :  { %824 = dma.done.wait [#allocation5], 4096  }
 0x141   :  { %825 = vsyncadd [#allocation5], 4294963200 }
 0x142   :  { %608 = vsyncpa [#allocation4], 1 }
 0x143   :  { %609 = vsyncpa [#allocation7], 1 }
 0x144   :  { %610 = vsyncpa [#allocation5], 1 }

</bundles_post_ra>
